<compile_context>
chip_gen: v7x
topology: tpu7x:2x2x1
jax: 0.10.0
libtpu: 0.0.40
codegen_flags: <defaults>
</compile_context>

<pallas_src>
import functools

import jax
import jax.numpy as jnp
import numpy as np
from jax.experimental import pallas as pl
from jax.experimental.pallas import tpu as pltpu


# ----------------------------- in-kernel math --------------------------------

def _erf_poly(x):
    # Abramowitz & Stegun 7.1.26 rational approximation, |error| < 1.5e-7.
    # TODO(synk): lax.erf has no reliable Pallas TPU lowering; this reproduces
    # torch.nn.GELU (exact erf form) to within fp32 noise.
    a1, a2, a3, a4, a5 = 0.254829592, -0.284496736, 1.421413741, -1.453152027, 1.061405429
    p = 0.3275911
    ax = jnp.abs(x)
    t = pl.reciprocal(1.0 + p * ax, approx=True)      # EUP slot, frees the VPU
    poly = ((((a5 * t + a4) * t + a3) * t + a2) * t + a1) * t
    r = 1.0 - poly * jnp.exp(-ax * ax)
    return jnp.where(x >= 0, r, -r)


def _gelu_exact(x):
    # torch.nn.GELU() (erf form); keep all elementwise math in f32
    # (v5e has no bf16 VPU/EUP, so bf16 elementwise would be converted anyway).
    return 0.5 * x * (1.0 + _erf_poly(x * 0.7071067811865476))


# ------------------------------- the kernel ----------------------------------

def _s4_kernel(u_ref, t_ref, w1_ref, w2_ref, b1_ref, b2_ref, o_ref,
               y_ref, z1_ref, z2_ref, *, B):
    """One (L-chunk, channel-chunk) grid step.

    u_ref : (ch_blk, B, L)      bf16  input, channel-major '(c h) b l'
    t_ref : (ch_blk, L, l_blk)  bf16  per-channel causal Toeplitz of k, D on diag
    w1_ref: (d_model, ch_blk)   bf16  first GLU half of the 1x1 output conv
    w2_ref: (d_model, ch_blk)   bf16  second GLU half
    b1_ref: (d_model, 1)        f32   bias, first GLU half
    b2_ref: (d_model, 1)        f32   bias, second GLU half
    o_ref : (B, d_model, l_blk) f32   output block (resident across the ch axis)
    y_ref : (ch_blk, B, l_blk)  bf16  scratch: post-GELU activations
    z1/z2 : (B, d_model, l_blk) f32   scratch accumulators for the GLU halves
    """
    ci = pl.program_id(1)

    @pl.when(ci == 0)
    def _init():
        # initialize the two GLU accumulators with the output-conv bias
        z1_ref[...] = jnp.broadcast_to(b1_ref[...][None], z1_ref.shape)
        z2_ref[...] = jnp.broadcast_to(b2_ref[...][None], z2_ref.shape)

    # depthwise causal conv with the D skip folded into the Toeplitz diagonal:
    #   y[c, b, l] = sum_s u[c, b, s] * T[c, s, l]
    # bf16 x bf16 -> f32 batched MXU matmul (batch over the channel chunk).
    y = jnp.einsum('cbs,csl->cbl', u_ref[...], t_ref[...],
                   preferred_element_type=jnp.float32)

    # activation (exact-erf GELU, f32); dropout == identity in the default config.
    y_ref[...] = _gelu_exact(y).astype(jnp.bfloat16)

    # output_linear (1x1 conv over channels) split into the two GLU halves:
    # two lane-aligned (d_model, ch_blk) @ (ch_blk, l_blk) matmuls per batch row,
    # accumulated over the channel-chunk grid axis (no mid-vreg lane slicing).
    w1 = w1_ref[...]
    w2 = w2_ref[...]
    for b in range(B):                               # static unroll; B is small
        yc = y_ref[:, b, :]                          # (ch_blk, l_blk) bf16
        z1_ref[b] += jnp.dot(w1, yc, preferred_element_type=jnp.float32)
        z2_ref[b] += jnp.dot(w2, yc, preferred_element_type=jnp.float32)

    @pl.when(ci == pl.num_programs(1) - 1)
    def _finalize():
        # GLU: out = z1 * sigmoid(z2)
        o_ref[...] = (z1_ref[...] * jax.nn.sigmoid(z2_ref[...])).astype(o_ref.dtype)


# ----------------------------- tiling heuristics ------------------------------

def _largest_divisor_leq(n, cap):
    cap = max(1, min(cap, n))
    for d in range(cap, 0, -1):
        if n % d == 0:
            return d
    return 1


def _pick_ch_block(CH):
    # channel chunk = pipelined reduction axis; prefer >= 2 chunks so the DMA of
    # the next Toeplitz block overlaps the MXU work on the current one.
    if CH <= 1:
        return 1
    return _largest_divisor_leq(CH, min(128, max(1, CH // 2)))


def _pick_l_block(L):
    # L-chunk = "parallel" output axis; lane dim must stay a multiple of 128
    # (or the full length at toy sizes).
    for cand in (512, 256, 128):
        if L > cand and L % cand == 0:
            return cand
    return L


def _vmem_budget(B, L, M, ch_blk, l_blk):
    # explicit VMEM budget (v7x has only 64 MiB / TensorCore): double-buffered
    # input/output blocks + single-buffered scratch + headroom.
    in_blk = (ch_blk * B * L * 2           # u block (bf16)
              + ch_blk * L * l_blk * 2     # Toeplitz block (bf16)
              + 2 * M * ch_blk * 2         # W1T / W2T blocks (bf16)
              + 2 * M * 4)                 # bias blocks (f32)
    out_blk = B * M * l_blk * 4
    scratch = ch_blk * B * l_blk * 2 + 2 * B * M * l_blk * 4
    need = 2 * (in_blk + out_blk) + scratch
    return int(min(max(2 * need, 32 * 1024 * 1024), 64 * 1024 * 1024))


# ------------------------- parameter packing (hoisted) ------------------------

def pack_params(k, D, W, bias, ch_blk):
    """Pack S4 parameters for the kernel.

    Depends only on (k, D, W, bias) -> in a real model this runs once per
    parameter update, not once per forward (it is the O(CH*L^2) Toeplitz build).
    """
    C, H, L = k.shape
    CH = C * H
    M = W.shape[0] // 2
    n_ch = CH // ch_blk

    # per-channel causal Toeplitz: T[ch, s, l] = k[ch, l-s] for l >= s, else 0
    k2 = k.reshape(CH, L).astype(jnp.float32)
    idx = jnp.arange(L)
    diff = idx[None, :] - idx[:, None]                          # (s, l) -> l - s
    T = jnp.where(diff >= 0, k2[:, jnp.clip(diff, 0, L - 1)], 0.0)   # (CH, L, L)
    # fold the D skip into the diagonal:  u @ (T + D*I) == conv(u, k) + D*u
    T = T + D.reshape(CH, 1, 1).astype(jnp.float32) * jnp.eye(L, dtype=jnp.float32)

    # 1x1 output conv split into its two GLU halves, pre-chunked over CH so the
    # kernel never slices a vreg mid-lane:  W?T[j, m, c] = W[m (+M), j*ch_blk + c]
    Wf = W.astype(jnp.float32)
    W1T = Wf[:M].reshape(M, n_ch, ch_blk).transpose(1, 0, 2)    # (n_ch, M, ch_blk)
    W2T = Wf[M:].reshape(M, n_ch, ch_blk).transpose(1, 0, 2)
    b1 = bias[:M].astype(jnp.float32).reshape(M, 1)
    b2 = bias[M:].astype(jnp.float32).reshape(M, 1)

    # bf16 matmul operands (MXU-native on v5e/v6e/v7x); f32 accumulation in-kernel.
    return (T.astype(jnp.bfloat16), W1T.astype(jnp.bfloat16),
            W2T.astype(jnp.bfloat16), b1, b2)


# --------------------------------- forward ------------------------------------

def s4_forward(u, params, *, channels=1):
    """u: (B, H, L) float32 (transposed=True layout). Returns (y, next_state=None)."""
    T, W1T, W2T, b1, b2 = params
    B, H, L = u.shape
    C = channels
    CH = C * H
    n_ch, M, ch_blk = W1T.shape
    assert n_ch * ch_blk == CH and T.shape == (CH, L, L)

    l_blk = _pick_l_block(L)
    n_l = L // l_blk

    # channel-major input '(c h) b l'; tiny relative to T, done once per forward.
    u_r = jnp.transpose(u, (1, 0, 2))
    if C > 1:
        # broadcast over SSM channels (c-major, matching the '(c h)' flattening)
        u_r = jnp.tile(u_r, (C, 1, 1))
    u_r = u_r.astype(jnp.bfloat16)

    grid_spec = pltpu.PrefetchScalarGridSpec(
        num_scalar_prefetch=0,
        grid=(n_l, n_ch),                      # (parallel, reduction) -- reduction last
        in_specs=[
            pl.BlockSpec((ch_blk, B, L), lambda li, ci: (ci, 0, 0)),
            pl.BlockSpec((ch_blk, L, l_blk), lambda li, ci: (ci, 0, li)),
            pl.BlockSpec((None, M, ch_blk), lambda li, ci: (ci, 0, 0)),
            pl.BlockSpec((None, M, ch_blk), lambda li, ci: (ci, 0, 0)),
            pl.BlockSpec((M, 1), lambda li, ci: (0, 0)),
            pl.BlockSpec((M, 1), lambda li, ci: (0, 0)),
        ],
        out_specs=pl.BlockSpec((B, M, l_blk), lambda li, ci: (0, 0, li)),
        scratch_shapes=[
            pltpu.VMEM((ch_blk, B, l_blk), jnp.bfloat16),   # post-GELU activations
            pltpu.VMEM((B, M, l_blk), jnp.float32),         # GLU half 1 accumulator
            pltpu.VMEM((B, M, l_blk), jnp.float32),         # GLU half 2 accumulator
        ],
    )

    y = pl.pallas_call(
        functools.partial(_s4_kernel, B=B),
        out_shape=jax.ShapeDtypeStruct((B, M, L), jnp.float32),
        grid_spec=grid_spec,
        compiler_params=pltpu.CompilerParams(
            dimension_semantics=("parallel", "arbitrary"),
            vmem_limit_bytes=_vmem_budget(B, L, M, ch_blk, l_blk)),
    )(u_r, T, W1T, W2T, b1, b2)
    return y, None      # next_state is None when state is None


# ----------------------------- synthetic params -------------------------------

def make_params(key, d_model, d_state, channels, L):
    """Deterministic synthetic parameters (shapes follow S4.__init__)."""
    H, N = d_model, d_state
    k_dt, k_cr, k_ci, k_D, k_W, k_b = jax.random.split(key, 6)

    # --- SSKernel: deterministic diagonal (S4D-Lin, ZOH) kernel, shape (channels, H, L) ---
    log_dt = jnp.log(1e-3) + jax.random.uniform(k_dt, (H,)) * (jnp.log(1e-1) - jnp.log(1e-3))
    dt = jnp.exp(log_dt)
    n2 = N // 2
    A = -0.5 + 1j * jnp.pi * jnp.arange(n2)
    Cc = (jax.random.normal(k_cr, (channels, H, n2))
          + 1j * jax.random.normal(k_ci, (channels, H, n2))) * (n2 ** -0.5)
    dtA = dt[:, None] * A[None, :]
    dB = (jnp.exp(dtA) - 1.0) / A[None, :]
    powers = jnp.exp(dtA[:, :, None] * jnp.arange(L)[None, None, :])
    k = 2.0 * jnp.real(jnp.einsum('chn,hnl->chl', Cc * dB[None], powers))
    k = k.astype(jnp.float32)                                   # (channels, H, L)

    D = jax.random.normal(k_D, (channels, H), jnp.float32)      # nn.Parameter(randn)
    W = jax.random.normal(k_W, (2 * d_model, channels * H), jnp.float32) / jnp.sqrt(channels * H)
    bias = jax.random.normal(k_b, (2 * d_model,), jnp.float32) * 0.1
    return k, D, W, bias


def s4_forward_ref(u, k, D, W, bias, *, d_model):
    """Pure-JAX f32 reference mirroring the PyTorch forward (FFT path)."""
    B, H, L = u.shape
    n = 2 * L
    k_f = jnp.fft.rfft(k, n=n)
    u_f = jnp.fft.rfft(u, n=n)
    y = jnp.fft.irfft(jnp.einsum('bhl,chl->bchl', u_f, k_f), n=n)[..., :L]
    y = y + jnp.einsum('bhl,ch->bchl', u, D)
    y = y.reshape(B, -1, L)
    y = jax.nn.gelu(y, approximate=False)
    z = jnp.einsum('oi,bil->bol', W, y) + bias[None, :, None]
    return z[:, :d_model] * jax.nn.sigmoid(z[:, d_model:])


if __name__ == "__main__":
    B, d_model, d_state, L = 2, 4, 64, 16

    # channels=1 is the module default; channels=2 exercises the c-major
    # broadcast / packing path flagged in the review.
    for channels in (1, 2):
        key = jax.random.PRNGKey(0)
        k_u, k_p = jax.random.split(key)
        u = jax.random.normal(k_u, (B, d_model, L), jnp.float32)       # (B, H, L)
        k, D, W, bias = make_params(k_p, d_model, d_state, channels, L)

        CH = channels * d_model
        ch_blk = _pick_ch_block(CH)
        params = pack_params(k, D, W, bias, ch_blk)     # once per parameter update

        y, next_state = s4_forward(u, params, channels=channels)
        y = jax.block_until_ready(y)

        y_ref = s4_forward_ref(u, k, D, W, bias, d_model=d_model)
        # tolerance sized for bf16 MXU operands (f32 accumulation).
        np.testing.assert_allclose(np.asarray(y), np.asarray(y_ref), rtol=5e-2, atol=5e-2)
        assert y.shape == (B, d_model, L) and next_state is None

    print("KERNEL_OK")
</pallas_src>

<mosaic_0001>
module attributes {stable_mosaic.version = 11 : i64} {
  func.func @_s4_kernel(%arg0: i32, %arg1: i32, %arg2: memref<2x2x16xbf16, #tpu.memory_space<vmem>>, %arg3: memref<2x16x16xbf16, #tpu.memory_space<vmem>>, %arg4: memref<1x4x2xbf16, #tpu.memory_space<vmem>>, %arg5: memref<1x4x2xbf16, #tpu.memory_space<vmem>>, %arg6: memref<4x1xf32, #tpu.memory_space<vmem>>, %arg7: memref<4x1xf32, #tpu.memory_space<vmem>>, %arg8: memref<2x4x16xf32, #tpu.memory_space<vmem>>, %arg9: memref<2x2x16xbf16, #tpu.memory_space<vmem>>, %arg10: memref<2x4x16xf32, #tpu.memory_space<vmem>>, %arg11: memref<2x4x16xf32, #tpu.memory_space<vmem>>) attributes {dimension_semantics = [#tpu.dimension_semantics<parallel>, #tpu.dimension_semantics<arbitrary>], iteration_bounds = array<i64: 1, 2>, scalar_prefetch = 0 : i64, scratch_operands = 3 : i64, tpu.core_type = #tpu.core_type<tc>, window_params = [{transform_indices = @transform_0, window_bounds = array<i64: 2, 2, 16>}, {transform_indices = @transform_1, window_bounds = array<i64: 2, 16, 16>}, {transform_indices = @transform_2, window_bounds = array<i64: 1, 4, 2>}, {transform_indices = @transform_3, window_bounds = array<i64: 1, 4, 2>}, {pipeline_mode = #tpu.pipeline_mode<synchronous>, transform_indices = @transform_4, window_bounds = array<i64: 4, 1>}, {pipeline_mode = #tpu.pipeline_mode<synchronous>, transform_indices = @transform_5, window_bounds = array<i64: 4, 1>}, {transform_indices = @transform_6, window_bounds = array<i64: 2, 4, 16>}]} {
    %c0_i32 = arith.constant 0 : i32
    %0 = arith.cmpi eq, %arg1, %c0_i32 : i32
    %1 = arith.extui %0 : i1 to i32
    %c0_i32_0 = arith.constant 0 : i32
    %2 = arith.cmpi ne, %1, %c0_i32_0 : i32
    scf.if %2 {
      %c0_63 = arith.constant 0 : index
      %c0_64 = arith.constant 0 : index
      %86 = vector.load %arg6[%c0_63, %c0_64] : memref<4x1xf32, #tpu.memory_space<vmem>>, vector<4x1xf32>
      %87 = vector.shape_cast %86 : vector<4x1xf32> to vector<1x4x1xf32>
      %88 = vector.shape_cast %87 : vector<1x4x1xf32> to vector<1x4x1xf32>
      %89 = vector.broadcast %88 : vector<1x4x1xf32> to vector<2x4x16xf32>
      %c0_65 = arith.constant 0 : index
      %c0_66 = arith.constant 0 : index
      %c0_67 = arith.constant 0 : index
      %90 = vector.load %arg10[%c0_65, %c0_66, %c0_67] : memref<2x4x16xf32, #tpu.memory_space<vmem>>, vector<2x4x16xf32>
      tpu.vector_store %arg10[%c0_65, %c0_66, %c0_67], %89 {strides = array<i32>} : memref<2x4x16xf32, #tpu.memory_space<vmem>>, vector<2x4x16xf32>,
      %c0_68 = arith.constant 0 : index
      %c0_69 = arith.constant 0 : index
      %91 = vector.load %arg7[%c0_68, %c0_69] : memref<4x1xf32, #tpu.memory_space<vmem>>, vector<4x1xf32>
      %92 = vector.shape_cast %91 : vector<4x1xf32> to vector<1x4x1xf32>
      %93 = vector.shape_cast %92 : vector<1x4x1xf32> to vector<1x4x1xf32>
      %94 = vector.broadcast %93 : vector<1x4x1xf32> to vector<2x4x16xf32>
      %c0_70 = arith.constant 0 : index
      %c0_71 = arith.constant 0 : index
      %c0_72 = arith.constant 0 : index
      %95 = vector.load %arg11[%c0_70, %c0_71, %c0_72] : memref<2x4x16xf32, #tpu.memory_space<vmem>>, vector<2x4x16xf32>
      tpu.vector_store %arg11[%c0_70, %c0_71, %c0_72], %94 {strides = array<i32>} : memref<2x4x16xf32, #tpu.memory_space<vmem>>, vector<2x4x16xf32>,
    } else {
    }
    %c0 = arith.constant 0 : index
    %c0_1 = arith.constant 0 : index
    %c0_2 = arith.constant 0 : index
    %3 = vector.load %arg2[%c0, %c0_1, %c0_2] : memref<2x2x16xbf16, #tpu.memory_space<vmem>>, vector<2x2x16xbf16>
    %c0_3 = arith.constant 0 : index
    %c0_4 = arith.constant 0 : index
    %c0_5 = arith.constant 0 : index
    %4 = vector.load %arg3[%c0_3, %c0_4, %c0_5] : memref<2x16x16xbf16, #tpu.memory_space<vmem>>, vector<2x16x16xbf16>
    "tpu.trace_start"() <{level = 10 : i32, message = "cbs,csl->cbl"}> : () -> ()
    %cst = arith.constant dense<0.000000e+00> : vector<2x2x16xf32>
    %5 = tpu.matmul %3, %4, %cst {dimension_numbers = #tpu.dot_dimension_numbers<[2], [1], [1], [2], [0, 0, 0, 1, 1, 2], [0], [0]>} : vector<2x2x16xbf16>, vector<2x16x16xbf16>, vector<2x2x16xf32> -> vector<2x2x16xf32>
    "tpu.trace_stop"() : () -> ()
    %cst_6 = arith.constant 5.000000e-01 : f32
    %6 = vector.broadcast %cst_6 : f32 to vector<2x2x16xf32>
    %7 = arith.mulf %6, %5 : vector<2x2x16xf32>
    %cst_7 = arith.constant 0.707106769 : f32
    %8 = vector.broadcast %cst_7 : f32 to vector<2x2x16xf32>
    %9 = arith.mulf %5, %8 : vector<2x2x16xf32>
    %10 = math.absf %9 : vector<2x2x16xf32>
    %cst_8 = arith.constant 0.327591091 : f32
    %11 = vector.broadcast %cst_8 : f32 to vector<2x2x16xf32>
    %12 = arith.mulf %11, %10 : vector<2x2x16xf32>
    %cst_9 = arith.constant 1.000000e+00 : f32
    %13 = vector.broadcast %cst_9 : f32 to vector<2x2x16xf32>
    %14 = arith.addf %13, %12 : vector<2x2x16xf32>
    %15 = tpu.reciprocal %14 {approx = true} : vector<2x2x16xf32> -> vector<2x2x16xf32>
    %cst_10 = arith.constant 1.06140542 : f32
    %16 = vector.broadcast %cst_10 : f32 to vector<2x2x16xf32>
    %17 = arith.mulf %16, %15 : vector<2x2x16xf32>
    %cst_11 = arith.constant -1.45315206 : f32
    %18 = vector.broadcast %cst_11 : f32 to vector<2x2x16xf32>
    %19 = arith.addf %17, %18 : vector<2x2x16xf32>
    %20 = arith.mulf %19, %15 : vector<2x2x16xf32>
    %cst_12 = arith.constant 1.42141378 : f32
    %21 = vector.broadcast %cst_12 : f32 to vector<2x2x16xf32>
    %22 = arith.addf %20, %21 : vector<2x2x16xf32>
    %23 = arith.mulf %22, %15 : vector<2x2x16xf32>
    %cst_13 = arith.constant -0.284496725 : f32
    %24 = vector.broadcast %cst_13 : f32 to vector<2x2x16xf32>
    %25 = arith.addf %23, %24 : vector<2x2x16xf32>
    %26 = arith.mulf %25, %15 : vector<2x2x16xf32>
    %cst_14 = arith.constant 0.254829586 : f32
    %27 = vector.broadcast %cst_14 : f32 to vector<2x2x16xf32>
    %28 = arith.addf %26, %27 : vector<2x2x16xf32>
    %29 = arith.mulf %28, %15 : vector<2x2x16xf32>
    %cst_15 = arith.constant 0.000000e+00 : f32
    %30 = vector.broadcast %cst_15 : f32 to vector<2x2x16xf32>
    %31 = arith.subf %30, %10 : vector<2x2x16xf32>
    %32 = arith.mulf %31, %10 : vector<2x2x16xf32>
    %33 = math.exp %32 : vector<2x2x16xf32>
    %34 = arith.mulf %29, %33 : vector<2x2x16xf32>
    %cst_16 = arith.constant 1.000000e+00 : f32
    %35 = vector.broadcast %cst_16 : f32 to vector<2x2x16xf32>
    %36 = arith.subf %35, %34 : vector<2x2x16xf32>
    %cst_17 = arith.constant 0.000000e+00 : f32
    %37 = vector.broadcast %cst_17 : f32 to vector<2x2x16xf32>
    %38 = arith.cmpf oge, %9, %37 : vector<2x2x16xf32>
    %cst_18 = arith.constant 0.000000e+00 : f32
    %39 = vector.broadcast %cst_18 : f32 to vector<2x2x16xf32>
    %40 = arith.subf %39, %36 : vector<2x2x16xf32>
    %41 = arith.select %38, %36, %40 : vector<2x2x16xi1>, vector<2x2x16xf32>
    %cst_19 = arith.constant 1.000000e+00 : f32
    %42 = vector.broadcast %cst_19 : f32 to vector<2x2x16xf32>
    %43 = arith.addf %42, %41 : vector<2x2x16xf32>
    %44 = arith.mulf %7, %43 : vector<2x2x16xf32>
    %45 = arith.truncf %44 : vector<2x2x16xf32> to vector<2x2x16xbf16>
    %c0_20 = arith.constant 0 : index
    %c0_21 = arith.constant 0 : index
    %c0_22 = arith.constant 0 : index
    %46 = vector.load %arg9[%c0_20, %c0_21, %c0_22] : memref<2x2x16xbf16, #tpu.memory_space<vmem>>, vector<2x2x16xbf16>
    tpu.vector_store %arg9[%c0_20, %c0_21, %c0_22], %45 {strides = array<i32>} : memref<2x2x16xbf16, #tpu.memory_space<vmem>>, vector<2x2x16xbf16>,
    %c0_23 = arith.constant 0 : index
    %c0_24 = arith.constant 0 : index
    %c0_25 = arith.constant 0 : index
    %47 = vector.load %arg4[%c0_23, %c0_24, %c0_25] : memref<1x4x2xbf16, #tpu.memory_space<vmem>>, vector<1x4x2xbf16>
    %48 = vector.shape_cast %47 : vector<1x4x2xbf16> to vector<4x2xbf16>
    %c0_26 = arith.constant 0 : index
    %c0_27 = arith.constant 0 : index
    %c0_28 = arith.constant 0 : index
    %49 = vector.load %arg5[%c0_26, %c0_27, %c0_28] : memref<1x4x2xbf16, #tpu.memory_space<vmem>>, vector<1x4x2xbf16>
    %50 = vector.shape_cast %49 : vector<1x4x2xbf16> to vector<4x2xbf16>
    %c0_29 = arith.constant 0 : index
    %c0_30 = arith.constant 0 : index
    %c0_31 = arith.constant 0 : index
    %51 = vector.load %arg9[%c0_29, %c0_30, %c0_31] : memref<2x2x16xbf16, #tpu.memory_space<vmem>>, vector<2x1x16xbf16>
    %52 = vector.shape_cast %51 : vector<2x1x16xbf16> to vector<2x16xbf16>
    %c0_32 = arith.constant 0 : index
    %c0_33 = arith.constant 0 : index
    %c0_34 = arith.constant 0 : index
    %53 = vector.load %arg10[%c0_32, %c0_33, %c0_34] : memref<2x4x16xf32, #tpu.memory_space<vmem>>, vector<1x4x16xf32>
    %54 = vector.shape_cast %53 : vector<1x4x16xf32> to vector<4x16xf32>
    %cst_35 = arith.constant dense<0.000000e+00> : vector<4x16xf32>
    %55 = tpu.matmul %48, %52, %cst_35 {dimension_numbers = #tpu.dot_dimension_numbers<[1], [0], [0], [1], [0, 0, 1, 1], [], []>} : vector<4x2xbf16>, vector<2x16xbf16>, vector<4x16xf32> -> vector<4x16xf32>
    %56 = arith.addf %54, %55 : vector<4x16xf32>
    %c0_36 = arith.constant 0 : index
    %c0_37 = arith.constant 0 : index
    %c0_38 = arith.constant 0 : index
    %57 = vector.load %arg10[%c0_36, %c0_37, %c0_38] : memref<2x4x16xf32, #tpu.memory_space<vmem>>, vector<1x4x16xf32>
    %58 = vector.shape_cast %57 : vector<1x4x16xf32> to vector<4x16xf32>
    %59 = vector.shape_cast %56 : vector<4x16xf32> to vector<1x4x16xf32>
    tpu.vector_store %arg10[%c0_36, %c0_37, %c0_38], %59 {strides = array<i32>} : memref<2x4x16xf32, #tpu.memory_space<vmem>>, vector<1x4x16xf32>,
    %c0_39 = arith.constant 0 : index
    %c0_40 = arith.constant 0 : index
    %c0_41 = arith.constant 0 : index
    %60 = vector.load %arg11[%c0_39, %c0_40, %c0_41] : memref<2x4x16xf32, #tpu.memory_space<vmem>>, vector<1x4x16xf32>
    %61 = vector.shape_cast %60 : vector<1x4x16xf32> to vector<4x16xf32>
    %cst_42 = arith.constant dense<0.000000e+00> : vector<4x16xf32>
    %62 = tpu.matmul %50, %52, %cst_42 {dimension_numbers = #tpu.dot_dimension_numbers<[1], [0], [0], [1], [0, 0, 1, 1], [], []>} : vector<4x2xbf16>, vector<2x16xbf16>, vector<4x16xf32> -> vector<4x16xf32>
    %63 = arith.addf %61, %62 : vector<4x16xf32>
    %c0_43 = arith.constant 0 : index
    %c0_44 = arith.constant 0 : index
    %c0_45 = arith.constant 0 : index
    %64 = vector.load %arg11[%c0_43, %c0_44, %c0_45] : memref<2x4x16xf32, #tpu.memory_space<vmem>>, vector<1x4x16xf32>
    %65 = vector.shape_cast %64 : vector<1x4x16xf32> to vector<4x16xf32>
    %66 = vector.shape_cast %63 : vector<4x16xf32> to vector<1x4x16xf32>
    tpu.vector_store %arg11[%c0_43, %c0_44, %c0_45], %66 {strides = array<i32>} : memref<2x4x16xf32, #tpu.memory_space<vmem>>, vector<1x4x16xf32>,
    %c0_46 = arith.constant 0 : index
    %c1 = arith.constant 1 : index
    %c0_47 = arith.constant 0 : index
    %67 = vector.load %arg9[%c0_46, %c1, %c0_47] : memref<2x2x16xbf16, #tpu.memory_space<vmem>>, vector<2x1x16xbf16>
    %68 = vector.shape_cast %67 : vector<2x1x16xbf16> to vector<2x16xbf16>
    %c1_48 = arith.constant 1 : index
    %c0_49 = arith.constant 0 : index
    %c0_50 = arith.constant 0 : index
    %69 = vector.load %arg10[%c1_48, %c0_49, %c0_50] : memref<2x4x16xf32, #tpu.memory_space<vmem>>, vector<1x4x16xf32>
    %70 = vector.shape_cast %69 : vector<1x4x16xf32> to vector<4x16xf32>
    %cst_51 = arith.constant dense<0.000000e+00> : vector<4x16xf32>
    %71 = tpu.matmul %48, %68, %cst_51 {dimension_numbers = #tpu.dot_dimension_numbers<[1], [0], [0], [1], [0, 0, 1, 1], [], []>} : vector<4x2xbf16>, vector<2x16xbf16>, vector<4x16xf32> -> vector<4x16xf32>
    %72 = arith.addf %70, %71 : vector<4x16xf32>
    %c1_52 = arith.constant 1 : index
    %c0_53 = arith.constant 0 : index
    %c0_54 = arith.constant 0 : index
    %73 = vector.load %arg10[%c1_52, %c0_53, %c0_54] : memref<2x4x16xf32, #tpu.memory_space<vmem>>, vector<1x4x16xf32>
    %74 = vector.shape_cast %73 : vector<1x4x16xf32> to vector<4x16xf32>
    %75 = vector.shape_cast %72 : vector<4x16xf32> to vector<1x4x16xf32>
    tpu.vector_store %arg10[%c1_52, %c0_53, %c0_54], %75 {strides = array<i32>} : memref<2x4x16xf32, #tpu.memory_space<vmem>>, vector<1x4x16xf32>,
    %c1_55 = arith.constant 1 : index
    %c0_56 = arith.constant 0 : index
    %c0_57 = arith.constant 0 : index
    %76 = vector.load %arg11[%c1_55, %c0_56, %c0_57] : memref<2x4x16xf32, #tpu.memory_space<vmem>>, vector<1x4x16xf32>
    %77 = vector.shape_cast %76 : vector<1x4x16xf32> to vector<4x16xf32>
    %cst_58 = arith.constant dense<0.000000e+00> : vector<4x16xf32>
    %78 = tpu.matmul %50, %68, %cst_58 {dimension_numbers = #tpu.dot_dimension_numbers<[1], [0], [0], [1], [0, 0, 1, 1], [], []>} : vector<4x2xbf16>, vector<2x16xbf16>, vector<4x16xf32> -> vector<4x16xf32>
    %79 = arith.addf %77, %78 : vector<4x16xf32>
    %c1_59 = arith.constant 1 : index
    %c0_60 = arith.constant 0 : index
    %c0_61 = arith.constant 0 : index
    %80 = vector.load %arg11[%c1_59, %c0_60, %c0_61] : memref<2x4x16xf32, #tpu.memory_space<vmem>>, vector<1x4x16xf32>
    %81 = vector.shape_cast %80 : vector<1x4x16xf32> to vector<4x16xf32>
    %82 = vector.shape_cast %79 : vector<4x16xf32> to vector<1x4x16xf32>
    tpu.vector_store %arg11[%c1_59, %c0_60, %c0_61], %82 {strides = array<i32>} : memref<2x4x16xf32, #tpu.memory_space<vmem>>, vector<1x4x16xf32>,
    %c1_i32 = arith.constant 1 : i32
    %83 = arith.cmpi eq, %arg1, %c1_i32 : i32
    %84 = arith.extui %83 : i1 to i32
    %c0_i32_62 = arith.constant 0 : i32
    %85 = arith.cmpi ne, %84, %c0_i32_62 : i32
    scf.if %85 {
      %c0_63 = arith.constant 0 : index
      %c0_64 = arith.constant 0 : index
      %c0_65 = arith.constant 0 : index
      %86 = vector.load %arg10[%c0_63, %c0_64, %c0_65] : memref<2x4x16xf32, #tpu.memory_space<vmem>>, vector<2x4x16xf32>
      %c0_66 = arith.constant 0 : index
      %c0_67 = arith.constant 0 : index
      %c0_68 = arith.constant 0 : index
      %87 = vector.load %arg11[%c0_66, %c0_67, %c0_68] : memref<2x4x16xf32, #tpu.memory_space<vmem>>, vector<2x4x16xf32>
      %88 = arith.negf %87 : vector<2x4x16xf32>
      %89 = math.exp %88 : vector<2x4x16xf32>
      %cst_69 = arith.constant 1.000000e+00 : f32
      %90 = vector.broadcast %cst_69 : f32 to vector<2x4x16xf32>
      %91 = arith.addf %90, %89 : vector<2x4x16xf32>
      %92 = arith.divf %90, %91 : vector<2x4x16xf32>
      %93 = arith.mulf %86, %92 : vector<2x4x16xf32>
      %c0_70 = arith.constant 0 : index
      %c0_71 = arith.constant 0 : index
      %c0_72 = arith.constant 0 : index
      %94 = vector.load %arg8[%c0_70, %c0_71, %c0_72] : memref<2x4x16xf32, #tpu.memory_space<vmem>>, vector<2x4x16xf32>
      tpu.vector_store %arg8[%c0_70, %c0_71, %c0_72], %93 {strides = array<i32>} : memref<2x4x16xf32, #tpu.memory_space<vmem>>, vector<2x4x16xf32>,
    } else {
    }
    return
  }
  func.func @transform_0(%arg0: i32, %arg1: i32) -> (i32, i32, i32) {
    %c0_i32 = arith.constant 0 : i32
    %c0_i32_0 = arith.constant 0 : i32
    %c0_i32_1 = arith.constant 0 : i32
    return %arg1, %c0_i32, %c0_i32_0 : i32, i32, i32
  }
  func.func @transform_1(%arg0: i32, %arg1: i32) -> (i32, i32, i32) {
    %c0_i32 = arith.constant 0 : i32
    %c0_i32_0 = arith.constant 0 : i32
    return %arg1, %c0_i32, %arg0 : i32, i32, i32
  }
  func.func @transform_2(%arg0: i32, %arg1: i32) -> (i32, i32, i32) {
    %c0_i32 = arith.constant 0 : i32
    %c0_i32_0 = arith.constant 0 : i32
    %c0_i32_1 = arith.constant 0 : i32
    return %arg1, %c0_i32, %c0_i32_0 : i32, i32, i32
  }
  func.func @transform_3(%arg0: i32, %arg1: i32) -> (i32, i32, i32) {
    %c0_i32 = arith.constant 0 : i32
    %c0_i32_0 = arith.constant 0 : i32
    %c0_i32_1 = arith.constant 0 : i32
    return %arg1, %c0_i32, %c0_i32_0 : i32, i32, i32
  }
  func.func @transform_4(%arg0: i32, %arg1: i32) -> (i32, i32) {
    %c0_i32 = arith.constant 0 : i32
    %c0_i32_0 = arith.constant 0 : i32
    %c0_i32_1 = arith.constant 0 : i32
    return %c0_i32, %c0_i32_0 : i32, i32
  }
  func.func @transform_5(%arg0: i32, %arg1: i32) -> (i32, i32) {
    %c0_i32 = arith.constant 0 : i32
    %c0_i32_0 = arith.constant 0 : i32
    %c0_i32_1 = arith.constant 0 : i32
    return %c0_i32, %c0_i32_0 : i32, i32
  }
  func.func @transform_6(%arg0: i32, %arg1: i32) -> (i32, i32, i32) {
    %c0_i32 = arith.constant 0 : i32
    %c0_i32_0 = arith.constant 0 : i32
    %c0_i32_1 = arith.constant 0 : i32
    return %c0_i32, %c0_i32_0, %arg0 : i32, i32, i32
  }
}

</mosaic_0001>

<bundles_post_ra>
// kernel: tpu_custom_call.1
= control target key start
LH: loop header
LB: loop body
LE: loop exit
PB: predicated region body
PF: predicated region fallthrough
CT: control target
= control target key end

     0   :  { %11 = vsyncpa [#allocation6], 0  ;;  %s1452_s0 = inlined_call_operand.vmem [shape: bf16[4,2,16], index: 0, kind: input, shape index: {}]   ;;  %s1453_s1 = inlined_call_operand.hbm [shape: bf16[4,16,16], index: 1, kind: input, shape index: {}]   ;;  %s1454_s2 = inlined_call_operand.vmem [shape: bf16[2,4,2], index: 2, kind: input, shape index: {}]   ;;  %s1455_s3 = inlined_call_operand.vmem [shape: bf16[2,4,2], index: 3, kind: input, shape index: {}]   ;;  %s1456_s4 = inlined_call_operand.vmem [shape: f32[4,1], index: 4, kind: input, shape index: {}]   ;;  %s1457_s5 = inlined_call_operand.vmem [shape: f32[4,1], index: 5, kind: input, shape index: {}]   ;;  %s1458_s6 = inlined_call_operand.hbm [shape: f32[2,4,16], index: 6, kind: output, shape index: {}]  }
   0x1   :  { %13 = vsyncpa [#allocation6 + $0x1], 0 }
   0x2   :  { %14 = vsyncpa [#allocation7], 0  ;;  %s1242_s21 = smov 0   ;;  %s1244_s22 = smov 0  }
   0x3   :  { %s1246_s23 = smov 0   ;;  %s1248_s24 = smov 0  }
   0x4   :  { %s1250_s25 = smov 0   ;;  %s1252_s26 = smov 0  }
   0x5 LB: > { %s914_s27 = sadd.s32 4294967295, %s1195_s26   ;;  %s29_s28 = sadd.s32 1, %s1191_s25  ;;  %s1195_s26 = sphi %s1252_s26, %s20_s26   ;;  %s1191_s25 = sphi %s1250_s25, %s1467_s25   ;;  %s1187_s24 = sphi %s1248_s24, %s1466_s24   ;;  %s1183_s23 = sphi %s1246_s23, %s1465_s23   ;;  %s1179_s22 = sphi %s1244_s22, %s1464_s22   ;;  %s1175_s21 = sphi %s1242_s21, %s1463_s21  }
   0x6   : > { %p30_p0 = scmp.ge.s32.totalorder %s29_s28, 2  ;;  %s67_s29 = sadd.s32 1, %s1183_s23 }
   0x7   : > { %p74_p1 = scmp.ne.s32.totalorder %s1183_s23, %s1179_s22  ;;  %p75_p2 = scmp.eq.s32.totalorder %s1195_s26, 0 }
   0x8   : > { %s1469_s28 = smov (%p30_p0, %s29_s28), 0  ;;  %p80_p4 = scmp.ne.s32.totalorder %s1179_s22, %s1175_s21 }
   0x9   : > { %p1278_p3 = por %p75_p2, %p74_p1  ;;  %s62_s7 = ssub.s32 %s1191_s25, %s1469_s28 }
   0xa   : > { %p81_p5 = scmp.eq.s32.totalorder %s914_s27, 0  ;;  %p65_p6 = scmp.eq.s32.totalorder %s62_s7, 0 }
   0xb   : > { %p1006_p8 = scmp.lt.s32.totalorder %s1195_s26, 2  ;;  %s238_s10 = sand.u32 1, %s1183_s23  }
   0xc   : > { %p1287_p7 = por %p81_p5, %p80_p4  ;;  %s947_s11 = sshll.u32 %s1191_s25, 8 }
   0xd   : > { %s1293_s9 = scalar_select %p65_p6, %s1183_s23, %s67_s29  }
   0xe   : > { %s917_s12 = sshll.u32 %s238_s10, 4  ;;  %s1300_s15 = scalar_lea.hbm %s1453_s1, %s947_s11 }
   0xf   : > { %s242_s16 = scalar_lea.vmem [#allocation5], %s917_s12  ;;  %p1304_p9 = pnand %p1006_p8, %p1278_p3 }
  0x10   : > { %s251_s17 = sshll.u32 %s242_s16, 4  ;;  %s1310_s19 = scalar_lea.sflag [#allocation6], %s238_s10  ;;  %s1308_s17 = int_to_ptr.vmem [resolvable:$true] %s251_s17 }
  0x11   : > { %s1085_s20 = scalar_lea.hbm %s1300_s15, 256  ;;  %p1087_p11 = pneg %p1304_p9 }
  0x12   : > { %p1086_p10 = scmp.ne.s32.totalorder %s1300_s15, %s1085_s20  ;;  %s1090_s30 = scalar_lea.hbm %s1453_s1, 512 }
  0x13   : > { %p1091_p0 = scmp.lt.u32.totalorder %s1300_s15, %s1453_s1  ;;  %p1092_p1 = scmp.lt.u32.totalorder %s1090_s30, %s1085_s20 }
  0x14   : > { %p1088_p12 = pnand %p1087_p11, %p1086_p10  ;;  %p1094_p3 = scmp.lt.u32.totalorder %s1085_s20, %s1300_s15 }
  0x15   : > { %p1093_p2 = por %p1092_p1, %p1091_p0 }
  0x16   : > { %p1089_p13 = pneg %p1088_p12 }
  0x17   : > { %p1095_p4 = por %p1094_p3, %p1093_p2 }
  0x19   : > { %p1096_p5 = pnand %p1095_p4, %p1089_p13 }
  0x1b   : > { %1099 = shalt.err (!%p1096_p5)
}
  0x1c   : > { %s1100_s10 = scalar_lea.vmem %s1308_s17, 256  ;;  %s1197_s12 = smov [#allocation5]  }
  0x1d   : > { %p1101_p6 = scmp.ne.s32.totalorder %s1308_s17, %s1100_s10  ;;  %s1105_s13 = sshll.u32 %s1197_s12, 4  ;;  %s1106_s13 = int_to_ptr.vmem [resolvable:$false] %s1105_s13 }
  0x1e   : > { %s1107_s14 = scalar_lea.vmem %s1106_s13, 512  ;;  %p1108_p12 = scmp.lt.s32.totalorder %s1308_s17, %s1106_s13 }
  0x1f   : > { %p1103_p8 = pnand %p1101_p6, %p1087_p11  ;;  %p1109_p0 = scmp.lt.s32.totalorder %s1107_s14, %s1100_s10 }
  0x21   : > { %p1104_p10 = pneg %p1103_p8  ;;  %p1110_p1 = por %p1109_p0, %p1108_p12 }
  0x23   : > { %p1111_p2 = pnand %p1110_p1, %p1104_p10 }
  0x25   : > { %1114 = shalt.err (!%p1111_p2)
}
  0x26   : > { %s1198_s16 = smov 64   ;;  %s1199_s20 = smov 4  }
  0x27   : > { %1005 = dma.hbm_to_vmem [thread:$0]  (!%p1304_p9), %s1300_s15, 256, %s1308_s17, %s1310_s19, %s1198_s16, %s1198_s16, %s1199_s20  }
  0x28   : > { %p921_p11 = scmp.ge.s32.totalorder %s1195_s26, 1  ;;  %p273_p13 = scmp.lt.s32.totalorder %s1195_s26, 3 }
  0x2a   : > { %p274_p3 = pnand %p921_p11, %p273_p13 }
  0x2b   : > { %s279_s21 = sand.u32 (!%p274_p3), 1, %s1179_s22  }
  0x2c   : > { %277 = sbr.rel (%p274_p3) target bundleno = 765 (0x2fd), region = 44  ;;  %s1341_s29 = sshll.u32 (!%p274_p3), %s279_s21, 4 }
  0x2d   : > { %s280_s30 = scalar_lea.sflag (!%p274_p3), [#allocation6], %s279_s21  ;;  %s283_s7 = scalar_lea.vmem (!%p274_p3), [#allocation5], %s1341_s29 }
  0x33   : > { %1166 = dma.done.wait (%p1287_p7), %s280_s30, 256  }
  0x34   : > { %1168 = vsyncadd (%p1287_p7), %s280_s30, 4294967040  ;;  %s923_s15 = sshll.u32 %s1187_s24, 1  ;;  %p325_p9 = scmp.lt.s32.totalorder %s1187_s24, 1 }
  0x35   : > { %p320_p4 = scmp.lt.s32.totalorder %s923_s15, 3  ;;  %p926_p7 = scmp.ne.s32.totalorder %s1187_s24, 0 }
  0x36   : > { %s326_s17 = scalar_select %p325_p9, %s1187_s24, 1 }
  0x37   : > { %s1471_s15 = smov (!%p320_p4, %s923_s15), 3  ;;  %337 = sbr.rel (%p926_p7) target bundleno = 191 (0xbf), region = 52 }
  0x38   : > { %s924_s18 = sshll.u32 %s326_s17, 1  ;;  %s1354_s10 = scalar_lea.vmem %s1452_s0, %s1471_s15  ;;  %v338_v0 = vld [vmem:[%s1456_s4] sm:$0xf] (!%p926_p7)  ;;  %v1200_v1 = vmov (!%p926_p7), 0   ;;  %vm344_vm0 = vcmask (!%p926_p7), 125952  }
  0x39   : > { %s1359_s14 = scalar_lea.vmem %s1454_s2, %s924_s18  ;;  %s1364_s20 = scalar_lea.vmem %s1455_s3, %s924_s18  ;;  %1066 = vset.pattern.permute.xlu0 (!%p926_p7), %v1200_v1  ;;  %v347_v2 = vld [vmem:[%s1457_s5] sm:$0xf] (!%p926_p7) }
  0x3a   : > { %341 = vperm.xlu0 (!%p926_p7), %1066, %v338_v0  }
  0x3e   : > { %350 = vperm.xlu0 %1066, %v347_v2  }
  0xb9   : > { %v342_v3 = vpop.permute.xlu0 %341 }
  0xba   : > { %345 = vst.msk [vmem:[#allocation3] sm:$0xf] %vm344_vm0, %v342_v3  ;;  %346 = vst.msk [vmem:[#allocation3 + $0x4] sm:$0xf] %vm344_vm0, %v342_v3 }
  0xbd   : > { %v351_v4 = vpop.permute.xlu0 %350 }
  0xbe   : > { %353 = vst.msk [vmem:[#allocation4] sm:$0xf] %vm344_vm0, %v351_v4  ;;  %354 = vst.msk [vmem:[#allocation4 + $0x4] sm:$0xf] %vm344_vm0, %v351_v4 }
  0xbf PF: > { %v1067_v5 = vld [vmem:[%s283_s7] sm:$0xff]   ;;  %v1201_v6 = vmov 0.0   ;;  %v1068_v7 = vld [vmem:[%s283_s7 + $0x8] sm:$0xff]   ;;  %vm1202_vm1 = vmmov 0   ;;  %vm367_vm2 = vcmask 130048   ;;  %vm514_vm5 = vcmask 122880  }
  0xc0   : > { %960 = vmatprep.subr.bf16.mxu0 %v1201_v6  ;;  %966 = vmatprep.subr.bf16.mxu1 %v1201_v6  ;;  %v355_v8 = vld [vmem:[%s1354_s10] sm:$0x1]  ;;  %v356_v9 = vld [vmem:[%s1354_s10 + $0x1] sm:$0x1]  ;;  %v1203_v3 = vmov 1966171168  }
  0xc1   : > { %961 = vmatpush3.bf16.msra.mxu0 %v1067_v5  ;;  %962 = vmatprep.mubr.msk.bf16.mxu0 %vm1202_vm1, %v1201_v6  ;;  %v532_v4 = vunpack.c.l.s4 %v1203_v3  ;;  %v534_v5 = vlaneseq  ;;  %vm555_vm6 = vcmask 1041409   ;;  %vm562_vm7 = vcmask 1040384   ;;  %p939_p5 = scmp.ne.s32.totalorder %s1187_s24, 1 }
  0xc2   : > { %967 = vmatpush3.bf16.msra.mxu1 %v1068_v7  ;;  %968 = vmatprep.mubr.msk.bf16.mxu1 %vm1202_vm1, %v1201_v6  ;;  %vm558_vm8 = vcmask 15360   ;;  %vm607_vm9 = vcmask 125952  }
  0xc3   : > { %972 = vmatprep.subr.bf16.mxu0 %v1201_v6  ;;  %978 = vmatprep.subr.bf16.mxu1 %v1201_v6 }
  0xc4   : > { %963 = vmatmul.mubr.msk.bf16.vlgmr.msra.gmra.mrb[0].mxu0 %vm367_vm2, %v355_v8 }
  0xc5   : > { %969 = vmatmul.mubr.msk.bf16.vlgmr.msra.gmra.mrb[0].mxu1 %vm367_vm2, %v356_v9  ;;  %974 = vmatprep.mubr.msk.bf16.mxu0 %vm1202_vm1, %v1201_v6 }
  0xc6   : > { %980 = vmatprep.mubr.msk.bf16.mxu1 %vm1202_vm1, %v1201_v6 }
 0x197   : > { %v405_v10 = vpop.f32.mrb[0].mxu0 }
 0x198   : > { %v462_v11 = vmul.f32 0.70710677, %v405_v10  ;;  %v454_v12 = vpop.f32.mrb[0].mxu1  ;;  %v964_v13 = vpop.f32.mrb[1].mxu0  ;;  %v460_v61 = vmul.f32 0.5, %v405_v10 }
 0x199   : > { %v463_v14 = vmul.f32 0.70710677, %v454_v12  ;;  %v970_v15 = vpop.f32.mrb[1].mxu1  ;;  %v408_v16 = vpop.f32.mrb[2].mxu0  ;;  %v461_v0 = vmul.f32 0.5, %v454_v12  ;;  %v533_v13 = vunpack.c.0.s8 %v532_v4 }
 0x19a   : > { %v464_v17 = vand.u32 2147483647, %v462_v11  ;;  %v457_v18 = vpop.f32.mrb[2].mxu1  ;;  %v965_v19 = vpop.f32.mrb[3].mxu0  ;;  %vm502_vm3 = vcmp.ge.f32.partialorder %v462_v11, 0.0  ;;  %v535_v15 = vshrl.u32 %v534_v5, 7 }
 0x19b   : > { %v465_v20 = vand.u32 2147483647, %v463_v14  ;;  %v971_v21 = vpop.f32.mrb[3].mxu1  ;;  %vm503_vm4 = vcmp.ge.f32.partialorder %v463_v14, 0.0 }
 0x19c   : > { %v466_v22 = vmul.f32 0.3275911, %v464_v17  ;;  %v490_v26 = vsub.f32 0.0, %v464_v17  ;;  %v536_v11 = vsub.s32 %v533_v13, %v535_v15 }
 0x19d   : > { %v467_v23 = vmul.f32 0.3275911, %v465_v20  ;;  %v491_v27 = vsub.f32 0.0, %v465_v20 }
 0x19e   : > { %v468_v24 = vadd.f32 1.0, %v466_v22  ;;  %v492_v29 = vmul.f32 %v490_v26, %v464_v17  ;;  %v517_v26 = vld [vmem:[%s1359_s14] sm:$0x3] }
 0x19f   : > { %v469_v25 = vadd.f32 1.0, %v467_v23  ;;  %v493_v32 = vmul.f32 %v491_v27, %v465_v20  ;;  %v518_v27 = vld [vmem:[%s1364_s20] sm:$0x3] }
 0x1a0   : > { %1069 = vrcp.f32 %v468_v24  ;;  %v494_v35 = vmul.f32 1.442695, %v492_v29  ;;  %v521_v29 = vld [vmem:[#allocation3] sm:$0xf] }
 0x1a1   : > { %1071 = vrcp.f32 %v469_v25  ;;  %v496_v38 = vmul.f32 1.442695, %v493_v32 }
 0x1a2   : > { %1073 = vpow2.f32 %v494_v35 }
 0x1a3   : > { %1075 = vpow2.f32 %v496_v38 }
 0x1aa   : > { %v1070_v28 = vpop.eup %1069 }
 0x1ab   : > { %v1072_v30 = vpop.eup %1071  ;;  %v472_v31 = vmul.f32 1.0614054, %v1070_v28 }
 0x1ac   : > { %v473_v33 = vmul.f32 1.0614054, %v1072_v30  ;;  %v1074_v51 = vpop.eup %1073 }
 0x1ad   : > { %v474_v34 = vadd.f32 -1.4531521, %v472_v31  ;;  %v1076_v53 = vpop.eup %1075 }
 0x1ae   : > { %v475_v36 = vadd.f32 -1.4531521, %v473_v33 }
 0x1af   : > { %v476_v37 = vmul.f32 %v1070_v28, %v474_v34 }
 0x1b0   : > { %v477_v39 = vmul.f32 %v1072_v30, %v475_v36 }
 0x1b1   : > { %v478_v40 = vadd.f32 1.4214138, %v476_v37 }
 0x1b2   : > { %v479_v41 = vadd.f32 1.4214138, %v477_v39 }
 0x1b3   : > { %v480_v42 = vmul.f32 %v1070_v28, %v478_v40 }
 0x1b4   : > { %v481_v43 = vmul.f32 %v1072_v30, %v479_v41  ;;  %v740_v41 = vld [vmem:[#allocation4 + $0x4] sm:$0xf] }
 0x1b5   : > { %v482_v44 = vadd.f32 -0.28449672, %v480_v42 }
 0x1b6   : > { %v483_v45 = vadd.f32 -0.28449672, %v481_v43 }
 0x1b7   : > { %v484_v46 = vmul.f32 %v1070_v28, %v482_v44 }
 0x1b8   : > { %v485_v47 = vmul.f32 %v1072_v30, %v483_v45 }
 0x1b9   : > { %v486_v48 = vadd.f32 0.2548296, %v484_v46 }
 0x1ba   : > { %v487_v49 = vadd.f32 0.2548296, %v485_v47 }
 0x1bb   : > { %v488_v50 = vmul.f32 %v1070_v28, %v486_v48 }
 0x1bc   : > { %v489_v52 = vmul.f32 %v1072_v30, %v487_v49  ;;  %v609_v30 = vld [vmem:[#allocation4] sm:$0xf] }
 0x1bd   : > { %v498_v54 = vmul.f32 %v1074_v51, %v488_v50 }
 0x1be   : > { %v499_v55 = vmul.f32 %v1076_v53, %v489_v52 }
 0x1bf   : > { %v500_v56 = vsub.f32 1.0, %v498_v54 }
 0x1c0   : > { %v501_v57 = vsub.f32 1.0, %v499_v55 }
 0x1c1   : > { %v504_v58 = vsub.f32 0.0, %v500_v56 }
 0x1c2   : > { %v505_v59 = vsub.f32 0.0, %v501_v57 }
 0x1c3   : > { %v506_v60 = vsel %vm502_vm3, %v500_v56, %v504_v58 }
 0x1c4   : > { %v508_v62 = vadd.f32 1.0, %v506_v60  ;;  %v507_v63 = vsel %vm503_vm4, %v501_v57, %v505_v59 }
 0x1c5   : > { %v509_v1 = vadd.f32 1.0, %v507_v63 }
 0x1c6   : > { %v510_v2 = vmul.f32 %v508_v62, %v460_v61 }
 0x1c7   : > { %v511_v7 = vmul.f32 %v509_v1, %v461_v0 }
 0x1c8   : > { %v512_v8 = vpack.c.bf16 %v510_v2, %v510_v2 }
 0x1c9   : > { %v513_v9 = vpack.c.bf16 %v511_v7, %v511_v7 }
 0x1ca   : > { %515 = vst.msk [vmem:[#allocation2] sm:$0x1] %vm514_vm5, %v512_v8 }
 0x1cb   : > { %516 = vst.msk [vmem:[#allocation2 + $0x1] sm:$0x1] %vm514_vm5, %v513_v9 }
 0x1d1   : > { %v931_v16 = vld.sshfl [vmem:[#allocation2] sm:$0x1 pattern:$0x75316420] }
 0x1d2   : > { %v932_v14 = vld.sshfl [vmem:[#allocation2 + $0x1] sm:$0x1 pattern:$0x75316420]  ;;  %v537_v10 = vrot.slane %v931_v16, %v536_v11 }
 0x1d3   : > { %v551_v17 = vrot.slane %v932_v14, %v536_v11 }
 0x1d4   : > { %v552_v12 = vunpack.c.l.b16 %v537_v10 }
 0x1d5   : > { %v553_v18 = vunpack.c.l.b16 %v551_v17 }
 0x1d6   : > { %v691_v19 = vrot.slane %v552_v12, 1 }
 0x1d7   : > { %v554_v20 = vrot.slane %v553_v18, 7 }
 0x1d8   : > { %v692_v22 = vsel %vm555_vm6, %v553_v18, %v691_v19 }
 0x1d9   : > { %v556_v21 = vsel %vm555_vm6, %v554_v20, %v552_v12  ;;  %v693_v25 = vpack.c.b16 %v692_v22, %v692_v22 }
 0x1da   : > { %v557_v23 = vpack.c.b16 %v556_v21, %v556_v21 }
 0x1db   : > { %v695_v28 = vsel %vm562_vm7, %v693_v25, 0 }
 0x1dc   : > { %v564_v24 = vsel %vm562_vm7, %v557_v23, 0 }
 0x1dd   : > { %973 = vmatpush3.bf16.msra.mxu0 %v564_v24  ;;  %979 = vmatpush3.bf16.msra.mxu1 %v564_v24 }
 0x1de   : > { %984 = vmatprep.subr.bf16.mxu0 %v1201_v6  ;;  %990 = vmatprep.subr.bf16.mxu1 %v1201_v6 }
 0x1e0   : > { %975 = vmatmul.mubr.msk.bf16.vlgmr.msra.gmra.mrb[4].mxu0 %vm558_vm8, %v517_v26  ;;  %981 = vmatmul.mubr.msk.bf16.vlgmr.msra.gmra.mrb[4].mxu1 %vm558_vm8, %v518_v27 }
 0x1e1   : > { %985 = vmatpush3.bf16.msra.mxu0 %v695_v28  ;;  %991 = vmatpush3.bf16.msra.mxu1 %v695_v28 }
 0x1e2   : > { %986 = vmatprep.mubr.msk.bf16.mxu0 %vm1202_vm1, %v1201_v6  ;;  %992 = vmatprep.mubr.msk.bf16.mxu1 %vm1202_vm1, %v1201_v6  ;;  %v658_v6 = vld [vmem:[#allocation3 + $0x4] sm:$0xf] }
 0x1e8   : > { %987 = vmatmul.mubr.msk.bf16.vlgmr.msra.gmra.mrb[8].mxu0 %vm558_vm8, %v517_v26  ;;  %993 = vmatmul.mubr.msk.bf16.vlgmr.msra.gmra.mrb[8].mxu1 %vm558_vm8, %v518_v27 }
 0x2b3   : > { %v600_v31 = vpop.f32.mrb[4].mxu0  ;;  %v647_v32 = vpop.f32.mrb[4].mxu1 }
 0x2b4   : > { %v606_v33 = vadd.f32 %v600_v31, %v521_v29  ;;  %v653_v34 = vadd.f32 %v647_v32, %v609_v30  ;;  %v976_v35 = vpop.f32.mrb[5].mxu0  ;;  %v982_v36 = vpop.f32.mrb[5].mxu1 }
 0x2b5   : > { %v603_v37 = vpop.f32.mrb[6].mxu0  ;;  %v650_v38 = vpop.f32.mrb[6].mxu1 }
 0x2b6   : > { %608 = vst.msk [vmem:[#allocation3] sm:$0xf] %vm607_vm9, %v606_v33  ;;  %654 = vst.msk [vmem:[#allocation4] sm:$0xf] %vm607_vm9, %v653_v34  ;;  %v977_v39 = vpop.f32.mrb[7].mxu0  ;;  %v983_v40 = vpop.f32.mrb[7].mxu1 }
 0x2b8   : > { %786 = sbr.rel (%p939_p5) target bundleno = 739 (0x2e3), region = 56 }
 0x2bb   : > { %v731_v42 = vpop.f32.mrb[8].mxu0  ;;  %v775_v43 = vpop.f32.mrb[8].mxu1 }
 0x2bc   : > { %v737_v44 = vadd.f32 %v731_v42, %v658_v6  ;;  %v781_v45 = vadd.f32 %v775_v43, %v740_v41  ;;  %v988_v46 = vpop.f32.mrb[9].mxu0  ;;  %v994_v47 = vpop.f32.mrb[9].mxu1 }
 0x2bd   : > { %v734_v48 = vpop.f32.mrb[10].mxu0  ;;  %v778_v49 = vpop.f32.mrb[10].mxu1  ;;  %v789_v52 = vld [vmem:[#allocation4] sm:$0xf] (!%p939_p5)  ;;  %v787_v60 = vld [vmem:[#allocation3] sm:$0xf] (!%p939_p5) }
 0x2be   : > { %738 = vst.msk [vmem:[#allocation3 + $0x4] sm:$0xf] %vm607_vm9, %v737_v44  ;;  %782 = vst.msk [vmem:[#allocation4 + $0x4] sm:$0xf] %vm607_vm9, %v781_v45  ;;  %v989_v50 = vpop.f32.mrb[11].mxu0  ;;  %v995_v51 = vpop.f32.mrb[11].mxu1 }
 0x2bf   : > { %v940_v53 = vmul.f32 -1.442695, %v789_v52 }
 0x2c1   : > { %1077 = vpow2.f32 %v940_v53 }
 0x2c5   : > { %v790_v54 = vld [vmem:[#allocation4 + $0x4] sm:$0xf]  ;;  %v788_v61 = vld [vmem:[#allocation3 + $0x4] sm:$0xf] }
 0x2c6   : > { %v941_v55 = vmul.f32 -1.442695, %v790_v54 }
 0x2c8   : > { %1079 = vpow2.f32 %v941_v55 }
 0x2cb   : > { %v1078_v56 = vpop.eup %1077 }
 0x2cc   : > { %v797_v58 = vadd.f32 1.0, %v1078_v56 }
 0x2ce   : > { %1081 = vrcp.f32 %v797_v58 }
 0x2d2   : > { %v1080_v57 = vpop.eup %1079 }
 0x2d3   : > { %v798_v59 = vadd.f32 1.0, %v1080_v57 }
 0x2d5   : > { %1083 = vrcp.f32 %v798_v59 }
 0x2d8   : > { %v1082_v62 = vpop.eup %1081 }
 0x2d9   : > { %v803_v0 = vmul.f32 %v1082_v62, %v787_v60 }
 0x2db   : > { %805 = vst.msk [vmem:[#allocation8] sm:$0xf] %vm607_vm9, %v803_v0 }
 0x2df   : > { %v1084_v63 = vpop.eup %1083 }
 0x2e0   : > { %v804_v1 = vmul.f32 %v1084_v63, %v788_v61 }
 0x2e2   : > { %806 = vst.msk [vmem:[#allocation8 + $0x4] sm:$0xf] %vm607_vm9, %v804_v1 }
 0x2e3 PF: > { %p1408_p6 = scmp.eq.s32.totalorder %s914_s27, 1  ;;  %s1204_s29 = smov [#allocation8]  }
 0x2e4   : > { %s815_s7 = sshll.u32 %s1204_s29, 4  ;;  %s816_s7 = int_to_ptr.vmem [resolvable:$true] %s815_s7 }
 0x2e5   : > { %s1115_s18 = scalar_lea.vmem %s816_s7, 128  ;;  %p1122_p0 = scmp.lt.s32.totalorder %s816_s7, %s816_s7 }
 0x2e6   : > { %p1116_p8 = scmp.ne.s32.totalorder %s816_s7, %s1115_s18  ;;  %p1123_p1 = scmp.lt.s32.totalorder %s1115_s18, %s1115_s18 }
 0x2e8   : > { %p1117_p10 = pnand %p1116_p8, %p1408_p6  ;;  %p1124_p2 = por %p1123_p1, %p1122_p0 }
 0x2ea   : > { %p1118_p12 = pneg %p1117_p10 }
 0x2ec   : > { %p1125_p11 = pnand %p1124_p2, %p1118_p12 }
 0x2ee   : > { %1128 = shalt.err (!%p1125_p11)
}
 0x2ef   : > { %s1129_s27 = scalar_lea.hbm %s1458_s6, 128 }
 0x2f0   : > { %p1130_p13 = scmp.ne.s32.totalorder %s1458_s6, %s1129_s27  ;;  %p1135_p4 = scmp.lt.u32.totalorder %s1129_s27, %s1458_s6 }
 0x2f2   : > { %p1131_p3 = pnand %p1130_p13, %p1408_p6 }
 0x2f4   : > { %p1132_p9 = pneg %p1131_p3 }
 0x2f6   : > { %p1137_p7 = pnand %p1135_p4, %p1132_p9 }
 0x2f8   : > { %1140 = shalt.err (!%p1137_p7)
}
 0x2f9   : > { %s1205_s8 = smov 64   ;;  %s1206_s16 = smov 4  }
 0x2fa   : > { %999 = dma.vmem_to_hbm [thread:$0]  (%p1408_p6), %s816_s7, 128, %s1458_s6, [#allocation7], %s1205_s8, %s1205_s8, %s1206_s16  }
 0x2fb   : > { %1170 = dma.done.wait (%p1408_p6), [#allocation7], 128  }
 0x2fc   : > { %1172 = vsyncadd (%p1408_p6), [#allocation7], 4294967168 }
 0x2fd PF: > { %s20_s26 = sadd.s32 1, %s1195_s26   ;;  %s1463_s21 = smov %s1179_s22 }
 0x2fe   : > { %p17_p5 = scmp.ge.s32.totalorder %s20_s26, 4   ;;  %s1464_s22 = smov %s1183_s23 }
 0x2ff   : > { %s1465_s23 = smov %s1293_s9  ;;  %s1466_s24 = smov %s1191_s25 }
 0x300   : > { %s1467_s25 = smov %s1469_s28  ;;  %19 = sbr.rel (!%p17_p5) target bundleno = 5 (0x5), region = 101 }
 0x307   :  { %831 = vsyncpa [#allocation6], 1 }
 0x308   :  { %833 = vsyncpa [#allocation6 + $0x1], 1 }
 0x309   :  { %834 = vsyncpa [#allocation7], 1 }
 0x30a   :  { %836 = vsyncpa [#allocation7 + $0x1], 1 }

</bundles_post_ra>
